<compile_context>
chip_gen: v5e
topology: v5e:2x2
jax: 0.10.0
libtpu: 0.0.40
codegen_flags: <defaults>
</compile_context>

<pallas_src>
import functools

import numpy as np
import jax
import jax.numpy as jnp
from jax import lax
from jax.experimental import pallas as pl
from jax.experimental.pallas import tpu as pltpu

_EPS = 1e-5


def _decoder_block_kernel(x_ref, w1_ref, w2_ref, w3_ref, ph_ref, po_ref,
                          g1_ref, b1_ref, g2_ref, b2_ref, g3_ref, b3_ref,
                          out_ref, halo_ref, *, H, inv_count):
    NH = x_ref.shape[0]                      # N * H packed rows

    def bn_train(h, p_ref, g_ref, b_ref):
        # nn.BatchNorm2d (train): biased batch stats over (N, H, W) per channel.
        # Single pass: per-lane sum / sum-of-squares, per-channel pooling via a
        # 0/1 matmul, then one fused scale/shift FMA over the activation.
        col_sum = jnp.sum(h, axis=0, keepdims=True)              # (1, L)
        col_sq = jnp.sum(h * h, axis=0, keepdims=True)           # (1, L)
        mean = jnp.dot(col_sum, p_ref[...],
                       preferred_element_type=jnp.float32) * inv_count
        ex2 = jnp.dot(col_sq, p_ref[...],
                      preferred_element_type=jnp.float32) * inv_count
        var = ex2 - mean * mean
        scale = g_ref[...] * lax.rsqrt(var + _EPS)               # (1, L)
        shift = b_ref[...] - mean * scale
        return h * scale + shift

    # conv1 (1x1) == one block-diagonal matmul, then ReLU, then BN.
    h1 = bn_train(
        jnp.maximum(jnp.dot(x_ref[...], w1_ref[...],
                            preferred_element_type=jnp.float32), 0.0),
        ph_ref, g1_ref, b1_ref)                                  # (NH, W*Ch)

    # conv2 (3x3, padding=1): dx taps + column zero-pad are folded into the
    # banded weight matrices; dy taps come from a 1-row halo scratch (static
    # slices) with an (NH, 1) image-row validity mask.
    halo_ref[...] = jnp.zeros_like(halo_ref)
    halo_ref[1:NH + 1, :] = h1
    i_row = lax.broadcasted_iota(jnp.int32, (NH, 1), 0) % H      # image row i
    acc = jnp.zeros_like(h1)
    for dy in (-1, 0, 1):
        if dy == 0:
            contrib = h1
        else:
            shifted = halo_ref[1 + dy:1 + dy + NH, :]            # h1 at row i+dy
            valid = (i_row + dy >= 0) & (i_row + dy < H)         # (NH, 1)
            contrib = jnp.where(valid, shifted, 0.0)
        acc = acc + jnp.dot(contrib, w2_ref[dy + 1],
                            preferred_element_type=jnp.float32)
    h2 = bn_train(jnp.maximum(acc, 0.0), ph_ref, g2_ref, b2_ref)  # (NH, W*Ch)

    # conv3 (1x1) on (h2 + h1), ReLU, BN.
    h3 = bn_train(
        jnp.maximum(jnp.dot(h2 + h1, w3_ref[...],
                            preferred_element_type=jnp.float32), 0.0),
        po_ref, g3_ref, b3_ref)                                   # (NH, W*Cout)
    out_ref[...] = h3.astype(out_ref.dtype)                       # lane-dense store


def decoder_block_pallas(x_nhwc, params):
    N, H, W, Cin = x_nhwc.shape
    w1 = params["w1"].astype(jnp.float32)          # (Cin, Ch)
    w2_hwio = params["w2"].astype(jnp.float32)     # (3, 3, Ch, Ch)
    w3 = params["w3"].astype(jnp.float32)          # (Ch, Cout)
    Ch, Cout = w1.shape[1], w3.shape[1]
    NH = N * H
    Lin, Lh, Lo = W * Cin, W * Ch, W * Cout

    # --- wrapper-side (plain JAX) packing & weight prep, done once per call ---
    x_p = x_nhwc.reshape(NH, Lin).astype(jnp.float32)       # lanes = (col, chan)

    eye_w = jnp.eye(W, dtype=jnp.float32)
    w1_bd = jnp.kron(eye_w, w1)                             # (Lin, Lh) block-diag
    w3_bd = jnp.kron(eye_w, w3)                             # (Lh, Lo)  block-diag

    # Banded block matrices for the 3x3 conv:
    #   band_ky[js*Ch + c, jd*Ch + o] = w2[ky, js-jd+1, c, o] if |js-jd| <= 1 else 0
    js = jnp.arange(W)[:, None]
    jd = jnp.arange(W)[None, :]
    dx = js - jd
    keep = (jnp.abs(dx) <= 1).astype(jnp.float32)           # (W, W)
    kx = jnp.clip(dx + 1, 0, 2)

    def band(w_ky):                                         # w_ky: (3, Ch, Ch)
        blocks = w_ky[kx] * keep[:, :, None, None]          # (W, W, Ch, Ch)
        return blocks.transpose(0, 2, 1, 3).reshape(Lh, Lh)

    w2_bands = jnp.stack([band(w2_hwio[ky]) for ky in range(3)])   # (3, Lh, Lh)

    def chan_pool(C):        # 0/1 matrix: lanes sharing a channel (lane % C)
        chan = jnp.arange(W * C) % C
        return (chan[:, None] == chan[None, :]).astype(jnp.float32)

    p_h, p_o = chan_pool(Ch), chan_pool(Cout)

    def lanes(v, C):         # per-channel vector -> per-lane row (1, W*C)
        return jnp.tile(v.astype(jnp.float32), W).reshape(1, W * C)

    kernel = functools.partial(_decoder_block_kernel, H=H,
                               inv_count=1.0 / float(N * H * W))

    def full(shape):
        zeros = (0,) * len(shape)
        return pl.BlockSpec(shape, lambda b: zeros)

    out_p = pl.pallas_call(
        kernel,
        out_shape=jax.ShapeDtypeStruct((NH, Lo), jnp.float32),
        grid=(1,),
        in_specs=[
            full((NH, Lin)),                     # packed input
            full((Lin, Lh)),                     # conv1 block-diagonal weight
            full((3, Lh, Lh)),                   # conv2 banded weights (per dy)
            full((Lh, Lo)),                      # conv3 block-diagonal weight
            full((Lh, Lh)), full((Lo, Lo)),      # BN channel-pooling matrices
            full((1, Lh)), full((1, Lh)),        # bn1 gamma / beta (per lane)
            full((1, Lh)), full((1, Lh)),        # bn2 gamma / beta
            full((1, Lo)), full((1, Lo)),        # bn3 gamma / beta
        ],
        out_specs=full((NH, Lo)),                # lane-dense output (N*H, W*Cout)
        scratch_shapes=[pltpu.VMEM((NH + 2, Lh), jnp.float32)],   # dy halo
        compiler_params=pltpu.CompilerParams(
            dimension_semantics=("arbitrary",),
            vmem_limit_bytes=32 * 1024 * 1024),  # explicit; actual use ~0.3 MiB
    )(x_p, w1_bd, w2_bands, w3_bd, p_h, p_o,
      lanes(params["g1"], Ch), lanes(params["b1"], Ch),
      lanes(params["g2"], Ch), lanes(params["b2"], Ch),
      lanes(params["g3"], Cout), lanes(params["b3"], Cout))
    return out_p.reshape(N, H, W, Cout)


def decoder_block_ref(x_nhwc, params):
    # Pure-JAX reference (same math, HIGHEST precision) for validation.
    hi = lax.Precision.HIGHEST

    def bn(h, g, b):
        mean = h.mean(axis=(0, 1, 2), keepdims=True)
        var = ((h - mean) ** 2).mean(axis=(0, 1, 2), keepdims=True)
        return (h - mean) / jnp.sqrt(var + _EPS) * g + b

    h1 = bn(jax.nn.relu(jnp.einsum('nhwc,co->nhwo', x_nhwc, params["w1"],
                                   precision=hi)),
            params["g1"], params["b1"])
    c2 = lax.conv_general_dilated(h1, params["w2"], (1, 1), 'SAME',
                                  dimension_numbers=('NHWC', 'HWIO', 'NHWC'),
                                  precision=hi)
    h2 = bn(jax.nn.relu(c2), params["g2"], params["b2"])
    h3 = bn(jax.nn.relu(jnp.einsum('nhwc,co->nhwo', h2 + h1, params["w3"],
                                   precision=hi)),
            params["g3"], params["b3"])
    return h3


if __name__ == "__main__":
    N, Cin, Ch, Cout, H, W = 2, 4, 8, 8, 16, 16

    key = jax.random.PRNGKey(0)
    (kx, k1, k2, k3,
     kg1, kb1, kg2, kb2, kg3, kb3) = jax.random.split(key, 10)

    # PyTorch-convention input (NCHW), transposed to the kernel layout (NHWC).
    x_nchw = jax.random.normal(kx, (N, Cin, H, W), jnp.float32)
    x_nhwc = jnp.transpose(x_nchw, (0, 2, 3, 1))

    params = {
        # conv weights (conv1.weight is (Ch,Cin,1,1) in torch -> (Cin,Ch) here;
        # conv2.weight (Ch,Ch,3,3) -> HWIO (3,3,Ch,Ch); conv3 -> (Ch,Cout)).
        "w1": 0.3 * jax.random.normal(k1, (Cin, Ch), jnp.float32),
        "w2": 0.1 * jax.random.normal(k2, (3, 3, Ch, Ch), jnp.float32),   # HWIO
        "w3": 0.3 * jax.random.normal(k3, (Ch, Cout), jnp.float32),
        # BatchNorm affine parameters (deterministic synthetic init)
        "g1": 1.0 + 0.1 * jax.random.normal(kg1, (Ch,), jnp.float32),
        "b1": 0.1 * jax.random.normal(kb1, (Ch,), jnp.float32),
        "g2": 1.0 + 0.1 * jax.random.normal(kg2, (Ch,), jnp.float32),
        "b2": 0.1 * jax.random.normal(kb2, (Ch,), jnp.float32),
        "g3": 1.0 + 0.1 * jax.random.normal(kg3, (Cout,), jnp.float32),
        "b3": 0.1 * jax.random.normal(kb3, (Cout,), jnp.float32),
    }

    out = jax.block_until_ready(decoder_block_pallas(x_nhwc, params))
    ref = decoder_block_ref(x_nhwc, params)
    np.testing.assert_allclose(np.asarray(out), np.asarray(ref),
                               rtol=1e-2, atol=1e-2)
    print("KERNEL_OK")
</pallas_src>

<mosaic_0001>
module attributes {stable_mosaic.version = 11 : i64} {
  func.func @_decoder_block_kernel(%arg0: i32, %arg1: memref<32x64xf32, #tpu.memory_space<vmem>>, %arg2: memref<64x128xf32, #tpu.memory_space<vmem>>, %arg3: memref<3x128x128xf32, #tpu.memory_space<vmem>>, %arg4: memref<128x128xf32, #tpu.memory_space<vmem>>, %arg5: memref<128x128xf32, #tpu.memory_space<vmem>>, %arg6: memref<128x128xf32, #tpu.memory_space<vmem>>, %arg7: memref<1x128xf32, #tpu.memory_space<vmem>>, %arg8: memref<1x128xf32, #tpu.memory_space<vmem>>, %arg9: memref<1x128xf32, #tpu.memory_space<vmem>>, %arg10: memref<1x128xf32, #tpu.memory_space<vmem>>, %arg11: memref<1x128xf32, #tpu.memory_space<vmem>>, %arg12: memref<1x128xf32, #tpu.memory_space<vmem>>, %arg13: memref<32x128xf32, #tpu.memory_space<vmem>>, %arg14: memref<34x128xf32, #tpu.memory_space<vmem>>) attributes {dimension_semantics = [#tpu.dimension_semantics<arbitrary>], iteration_bounds = array<i64: 1>, scalar_prefetch = 0 : i64, scratch_operands = 1 : i64, tpu.core_type = #tpu.core_type<tc>, window_params = [{pipeline_mode = #tpu.pipeline_mode<synchronous>, transform_indices = @transform_0, window_bounds = array<i64: 32, 64>}, {pipeline_mode = #tpu.pipeline_mode<synchronous>, transform_indices = @transform_1, window_bounds = array<i64: 64, 128>}, {pipeline_mode = #tpu.pipeline_mode<synchronous>, transform_indices = @transform_2, window_bounds = array<i64: 3, 128, 128>}, {pipeline_mode = #tpu.pipeline_mode<synchronous>, transform_indices = @transform_3, window_bounds = array<i64: 128, 128>}, {pipeline_mode = #tpu.pipeline_mode<synchronous>, transform_indices = @transform_4, window_bounds = array<i64: 128, 128>}, {pipeline_mode = #tpu.pipeline_mode<synchronous>, transform_indices = @transform_5, window_bounds = array<i64: 128, 128>}, {pipeline_mode = #tpu.pipeline_mode<synchronous>, transform_indices = @transform_6, window_bounds = array<i64: 1, 128>}, {pipeline_mode = #tpu.pipeline_mode<synchronous>, transform_indices = @transform_7, window_bounds = array<i64: 1, 128>}, {pipeline_mode = #tpu.pipeline_mode<synchronous>, transform_indices = @transform_8, window_bounds = array<i64: 1, 128>}, {pipeline_mode = #tpu.pipeline_mode<synchronous>, transform_indices = @transform_9, window_bounds = array<i64: 1, 128>}, {pipeline_mode = #tpu.pipeline_mode<synchronous>, transform_indices = @transform_10, window_bounds = array<i64: 1, 128>}, {pipeline_mode = #tpu.pipeline_mode<synchronous>, transform_indices = @transform_11, window_bounds = array<i64: 1, 128>}, {pipeline_mode = #tpu.pipeline_mode<synchronous>, transform_indices = @transform_12, window_bounds = array<i64: 32, 128>}]} {
    %c0 = arith.constant 0 : index
    %c0_0 = arith.constant 0 : index
    %0 = vector.load %arg1[%c0, %c0_0] : memref<32x64xf32, #tpu.memory_space<vmem>>, vector<32x64xf32>
    %c0_1 = arith.constant 0 : index
    %c0_2 = arith.constant 0 : index
    %1 = vector.load %arg2[%c0_1, %c0_2] : memref<64x128xf32, #tpu.memory_space<vmem>>, vector<64x128xf32>
    %cst = arith.constant dense<0.000000e+00> : vector<32x128xf32>
    %2 = tpu.matmul %0, %1, %cst {dimension_numbers = #tpu.dot_dimension_numbers<[1], [0], [0], [1], [0, 0, 1, 1], [], []>} : vector<32x64xf32>, vector<64x128xf32>, vector<32x128xf32> -> vector<32x128xf32>
    %cst_3 = arith.constant 0.000000e+00 : f32
    %3 = vector.broadcast %cst_3 : f32 to vector<32x128xf32>
    %4 = arith.maximumf %2, %3 : vector<32x128xf32>
    %cst_4 = arith.constant dense<0.000000e+00> : vector<128xf32>
    %5 = vector.multi_reduction <add>, %4, %cst_4 [0] : vector<32x128xf32> to vector<128xf32>
    %6 = vector.shape_cast %5 : vector<128xf32> to vector<1x128xf32>
    %7 = arith.mulf %4, %4 : vector<32x128xf32>
    %cst_5 = arith.constant dense<0.000000e+00> : vector<128xf32>
    %8 = vector.multi_reduction <add>, %7, %cst_5 [0] : vector<32x128xf32> to vector<128xf32>
    %9 = vector.shape_cast %8 : vector<128xf32> to vector<1x128xf32>
    %c0_6 = arith.constant 0 : index
    %c0_7 = arith.constant 0 : index
    %10 = vector.load %arg5[%c0_6, %c0_7] : memref<128x128xf32, #tpu.memory_space<vmem>>, vector<128x128xf32>
    %cst_8 = arith.constant dense<0.000000e+00> : vector<1x128xf32>
    %11 = tpu.matmul %6, %10, %cst_8 {dimension_numbers = #tpu.dot_dimension_numbers<[1], [0], [0], [1], [0, 0, 1, 1], [], []>} : vector<1x128xf32>, vector<128x128xf32>, vector<1x128xf32> -> vector<1x128xf32>
    %cst_9 = arith.constant 0.001953125 : f32
    %12 = vector.broadcast %cst_9 : f32 to vector<1x128xf32>
    %13 = arith.mulf %11, %12 : vector<1x128xf32>
    %c0_10 = arith.constant 0 : index
    %c0_11 = arith.constant 0 : index
    %14 = vector.load %arg5[%c0_10, %c0_11] : memref<128x128xf32, #tpu.memory_space<vmem>>, vector<128x128xf32>
    %cst_12 = arith.constant dense<0.000000e+00> : vector<1x128xf32>
    %15 = tpu.matmul %9, %14, %cst_12 {dimension_numbers = #tpu.dot_dimension_numbers<[1], [0], [0], [1], [0, 0, 1, 1], [], []>} : vector<1x128xf32>, vector<128x128xf32>, vector<1x128xf32> -> vector<1x128xf32>
    %cst_13 = arith.constant 0.001953125 : f32
    %16 = vector.broadcast %cst_13 : f32 to vector<1x128xf32>
    %17 = arith.mulf %15, %16 : vector<1x128xf32>
    %18 = arith.mulf %13, %13 : vector<1x128xf32>
    %19 = arith.subf %17, %18 : vector<1x128xf32>
    %c0_14 = arith.constant 0 : index
    %c0_15 = arith.constant 0 : index
    %20 = vector.load %arg7[%c0_14, %c0_15] : memref<1x128xf32, #tpu.memory_space<vmem>>, vector<1x128xf32>
    %cst_16 = arith.constant 9.99999974E-6 : f32
    %21 = vector.broadcast %cst_16 : f32 to vector<1x128xf32>
    %22 = arith.addf %19, %21 : vector<1x128xf32>
    %23 = math.rsqrt %22 : vector<1x128xf32>
    %24 = arith.mulf %20, %23 : vector<1x128xf32>
    %c0_17 = arith.constant 0 : index
    %c0_18 = arith.constant 0 : index
    %25 = vector.load %arg8[%c0_17, %c0_18] : memref<1x128xf32, #tpu.memory_space<vmem>>, vector<1x128xf32>
    %26 = arith.mulf %13, %24 : vector<1x128xf32>
    %27 = arith.subf %25, %26 : vector<1x128xf32>
    %28 = vector.broadcast %24 : vector<1x128xf32> to vector<32x128xf32>
    %29 = arith.mulf %4, %28 : vector<32x128xf32>
    %30 = vector.broadcast %27 : vector<1x128xf32> to vector<32x128xf32>
    %31 = arith.addf %29, %30 : vector<32x128xf32>
    %cst_19 = arith.constant 0.000000e+00 : f32
    %32 = vector.broadcast %cst_19 : f32 to vector<34x128xf32>
    %c0_20 = arith.constant 0 : index
    %c0_21 = arith.constant 0 : index
    %33 = vector.load %arg14[%c0_20, %c0_21] : memref<34x128xf32, #tpu.memory_space<vmem>>, vector<34x128xf32>
    tpu.vector_store %arg14[%c0_20, %c0_21], %32 {strides = array<i32>} : memref<34x128xf32, #tpu.memory_space<vmem>>, vector<34x128xf32>,
    %c1 = arith.constant 1 : index
    %c0_22 = arith.constant 0 : index
    %34 = vector.load %arg14[%c1, %c0_22] : memref<34x128xf32, #tpu.memory_space<vmem>>, vector<32x128xf32>
    tpu.vector_store %arg14[%c1, %c0_22], %31 {strides = array<i32>} : memref<34x128xf32, #tpu.memory_space<vmem>>, vector<32x128xf32>,
    %35 = tpu.iota {dimensions = array<i32: 0>} : vector<32x1xi32>
    %c16_i32 = arith.constant 16 : i32
    %c0_i32 = arith.constant 0 : i32
    %36 = arith.cmpi eq, %c16_i32, %c0_i32 : i32
    %c1_i32 = arith.constant 1 : i32
    %37 = arith.select %36, %c1_i32, %c16_i32 : i32
    %38 = vector.broadcast %37 : i32 to vector<32x1xi32>
    %39 = arith.remsi %35, %38 : vector<32x1xi32>
    %c0_i32_23 = arith.constant 0 : i32
    %40 = vector.broadcast %c0_i32_23 : i32 to vector<32x1xi32>
    %41 = arith.cmpi ne, %39, %40 : vector<32x1xi32>
    %c0_i32_24 = arith.constant 0 : i32
    %42 = vector.broadcast %c0_i32_24 : i32 to vector<32x1xi32>
    %43 = arith.cmpi slt, %39, %42 : vector<32x1xi32>
    %c0_i32_25 = arith.constant 0 : i32
    %44 = arith.cmpi slt, %37, %c0_i32_25 : i32
    %45 = vector.broadcast %44 : i1 to vector<32x1xi1>
    %46 = vector.broadcast %45 : vector<32x1xi1> to vector<32x1xi1>
    %47 = arith.xori %43, %46 : vector<32x1xi1>
    %48 = arith.andi %47, %41 : vector<32x1xi1>
    %49 = vector.broadcast %37 : i32 to vector<32x1xi32>
    %50 = arith.addi %39, %49 : vector<32x1xi32>
    %51 = arith.select %48, %50, %39 : vector<32x1xi1>, vector<32x1xi32>
    %cst_26 = arith.constant 0.000000e+00 : f32
    %52 = vector.broadcast %cst_26 : f32 to vector<32x128xf32>
    %c0_27 = arith.constant 0 : index
    %c0_28 = arith.constant 0 : index
    %53 = vector.load %arg14[%c0_27, %c0_28] : memref<34x128xf32, #tpu.memory_space<vmem>>, vector<32x128xf32>
    %c-1_i32 = arith.constant -1 : i32
    %54 = vector.broadcast %c-1_i32 : i32 to vector<32x1xi32>
    %55 = arith.addi %51, %54 : vector<32x1xi32>
    %c0_i32_29 = arith.constant 0 : i32
    %56 = vector.broadcast %c0_i32_29 : i32 to vector<32x1xi32>
    %57 = arith.cmpi sge, %55, %56 : vector<32x1xi32>
    %c-1_i32_30 = arith.constant -1 : i32
    %58 = vector.broadcast %c-1_i32_30 : i32 to vector<32x1xi32>
    %59 = arith.addi %51, %58 : vector<32x1xi32>
    %c16_i32_31 = arith.constant 16 : i32
    %60 = vector.broadcast %c16_i32_31 : i32 to vector<32x1xi32>
    %61 = arith.cmpi slt, %59, %60 : vector<32x1xi32>
    %62 = arith.andi %57, %61 : vector<32x1xi1>
    %cst_32 = arith.constant 0.000000e+00 : f32
    %63 = vector.shape_cast %62 : vector<32x1xi1> to vector<32x1xi1>
    %64 = vector.broadcast %63 : vector<32x1xi1> to vector<32x128xi1>
    %65 = vector.broadcast %cst_32 : f32 to vector<32x128xf32>
    %66 = arith.select %64, %53, %65 : vector<32x128xi1>, vector<32x128xf32>
    %c0_33 = arith.constant 0 : index
    %c0_34 = arith.constant 0 : index
    %c0_35 = arith.constant 0 : index
    %67 = vector.load %arg3[%c0_33, %c0_34, %c0_35] : memref<3x128x128xf32, #tpu.memory_space<vmem>>, vector<1x128x128xf32>
    %68 = vector.shape_cast %67 : vector<1x128x128xf32> to vector<128x128xf32>
    %cst_36 = arith.constant dense<0.000000e+00> : vector<32x128xf32>
    %69 = tpu.matmul %66, %68, %cst_36 {dimension_numbers = #tpu.dot_dimension_numbers<[1], [0], [0], [1], [0, 0, 1, 1], [], []>} : vector<32x128xf32>, vector<128x128xf32>, vector<32x128xf32> -> vector<32x128xf32>
    %70 = arith.addf %52, %69 : vector<32x128xf32>
    %c1_37 = arith.constant 1 : index
    %c0_38 = arith.constant 0 : index
    %c0_39 = arith.constant 0 : index
    %71 = vector.load %arg3[%c1_37, %c0_38, %c0_39] : memref<3x128x128xf32, #tpu.memory_space<vmem>>, vector<1x128x128xf32>
    %72 = vector.shape_cast %71 : vector<1x128x128xf32> to vector<128x128xf32>
    %cst_40 = arith.constant dense<0.000000e+00> : vector<32x128xf32>
    %73 = tpu.matmul %31, %72, %cst_40 {dimension_numbers = #tpu.dot_dimension_numbers<[1], [0], [0], [1], [0, 0, 1, 1], [], []>} : vector<32x128xf32>, vector<128x128xf32>, vector<32x128xf32> -> vector<32x128xf32>
    %74 = arith.addf %70, %73 : vector<32x128xf32>
    %c2 = arith.constant 2 : index
    %c0_41 = arith.constant 0 : index
    %75 = vector.load %arg14[%c2, %c0_41] : memref<34x128xf32, #tpu.memory_space<vmem>>, vector<32x128xf32>
    %c1_i32_42 = arith.constant 1 : i32
    %76 = vector.broadcast %c1_i32_42 : i32 to vector<32x1xi32>
    %77 = arith.addi %51, %76 : vector<32x1xi32>
    %c0_i32_43 = arith.constant 0 : i32
    %78 = vector.broadcast %c0_i32_43 : i32 to vector<32x1xi32>
    %79 = arith.cmpi sge, %77, %78 : vector<32x1xi32>
    %c1_i32_44 = arith.constant 1 : i32
    %80 = vector.broadcast %c1_i32_44 : i32 to vector<32x1xi32>
    %81 = arith.addi %51, %80 : vector<32x1xi32>
    %c16_i32_45 = arith.constant 16 : i32
    %82 = vector.broadcast %c16_i32_45 : i32 to vector<32x1xi32>
    %83 = arith.cmpi slt, %81, %82 : vector<32x1xi32>
    %84 = arith.andi %79, %83 : vector<32x1xi1>
    %cst_46 = arith.constant 0.000000e+00 : f32
    %85 = vector.shape_cast %84 : vector<32x1xi1> to vector<32x1xi1>
    %86 = vector.broadcast %85 : vector<32x1xi1> to vector<32x128xi1>
    %87 = vector.broadcast %cst_46 : f32 to vector<32x128xf32>
    %88 = arith.select %86, %75, %87 : vector<32x128xi1>, vector<32x128xf32>
    %c2_47 = arith.constant 2 : index
    %c0_48 = arith.constant 0 : index
    %c0_49 = arith.constant 0 : index
    %89 = vector.load %arg3[%c2_47, %c0_48, %c0_49] : memref<3x128x128xf32, #tpu.memory_space<vmem>>, vector<1x128x128xf32>
    %90 = vector.shape_cast %89 : vector<1x128x128xf32> to vector<128x128xf32>
    %cst_50 = arith.constant dense<0.000000e+00> : vector<32x128xf32>
    %91 = tpu.matmul %88, %90, %cst_50 {dimension_numbers = #tpu.dot_dimension_numbers<[1], [0], [0], [1], [0, 0, 1, 1], [], []>} : vector<32x128xf32>, vector<128x128xf32>, vector<32x128xf32> -> vector<32x128xf32>
    %92 = arith.addf %74, %91 : vector<32x128xf32>
    %cst_51 = arith.constant 0.000000e+00 : f32
    %93 = vector.broadcast %cst_51 : f32 to vector<32x128xf32>
    %94 = arith.maximumf %92, %93 : vector<32x128xf32>
    %cst_52 = arith.constant dense<0.000000e+00> : vector<128xf32>
    %95 = vector.multi_reduction <add>, %94, %cst_52 [0] : vector<32x128xf32> to vector<128xf32>
    %96 = vector.shape_cast %95 : vector<128xf32> to vector<1x128xf32>
    %97 = arith.mulf %94, %94 : vector<32x128xf32>
    %cst_53 = arith.constant dense<0.000000e+00> : vector<128xf32>
    %98 = vector.multi_reduction <add>, %97, %cst_53 [0] : vector<32x128xf32> to vector<128xf32>
    %99 = vector.shape_cast %98 : vector<128xf32> to vector<1x128xf32>
    %c0_54 = arith.constant 0 : index
    %c0_55 = arith.constant 0 : index
    %100 = vector.load %arg5[%c0_54, %c0_55] : memref<128x128xf32, #tpu.memory_space<vmem>>, vector<128x128xf32>
    %cst_56 = arith.constant dense<0.000000e+00> : vector<1x128xf32>
    %101 = tpu.matmul %96, %100, %cst_56 {dimension_numbers = #tpu.dot_dimension_numbers<[1], [0], [0], [1], [0, 0, 1, 1], [], []>} : vector<1x128xf32>, vector<128x128xf32>, vector<1x128xf32> -> vector<1x128xf32>
    %cst_57 = arith.constant 0.001953125 : f32
    %102 = vector.broadcast %cst_57 : f32 to vector<1x128xf32>
    %103 = arith.mulf %101, %102 : vector<1x128xf32>
    %c0_58 = arith.constant 0 : index
    %c0_59 = arith.constant 0 : index
    %104 = vector.load %arg5[%c0_58, %c0_59] : memref<128x128xf32, #tpu.memory_space<vmem>>, vector<128x128xf32>
    %cst_60 = arith.constant dense<0.000000e+00> : vector<1x128xf32>
    %105 = tpu.matmul %99, %104, %cst_60 {dimension_numbers = #tpu.dot_dimension_numbers<[1], [0], [0], [1], [0, 0, 1, 1], [], []>} : vector<1x128xf32>, vector<128x128xf32>, vector<1x128xf32> -> vector<1x128xf32>
    %cst_61 = arith.constant 0.001953125 : f32
    %106 = vector.broadcast %cst_61 : f32 to vector<1x128xf32>
    %107 = arith.mulf %105, %106 : vector<1x128xf32>
    %108 = arith.mulf %103, %103 : vector<1x128xf32>
    %109 = arith.subf %107, %108 : vector<1x128xf32>
    %c0_62 = arith.constant 0 : index
    %c0_63 = arith.constant 0 : index
    %110 = vector.load %arg9[%c0_62, %c0_63] : memref<1x128xf32, #tpu.memory_space<vmem>>, vector<1x128xf32>
    %cst_64 = arith.constant 9.99999974E-6 : f32
    %111 = vector.broadcast %cst_64 : f32 to vector<1x128xf32>
    %112 = arith.addf %109, %111 : vector<1x128xf32>
    %113 = math.rsqrt %112 : vector<1x128xf32>
    %114 = arith.mulf %110, %113 : vector<1x128xf32>
    %c0_65 = arith.constant 0 : index
    %c0_66 = arith.constant 0 : index
    %115 = vector.load %arg10[%c0_65, %c0_66] : memref<1x128xf32, #tpu.memory_space<vmem>>, vector<1x128xf32>
    %116 = arith.mulf %103, %114 : vector<1x128xf32>
    %117 = arith.subf %115, %116 : vector<1x128xf32>
    %118 = vector.broadcast %114 : vector<1x128xf32> to vector<32x128xf32>
    %119 = arith.mulf %94, %118 : vector<32x128xf32>
    %120 = vector.broadcast %117 : vector<1x128xf32> to vector<32x128xf32>
    %121 = arith.addf %119, %120 : vector<32x128xf32>
    %122 = arith.addf %121, %31 : vector<32x128xf32>
    %c0_67 = arith.constant 0 : index
    %c0_68 = arith.constant 0 : index
    %123 = vector.load %arg4[%c0_67, %c0_68] : memref<128x128xf32, #tpu.memory_space<vmem>>, vector<128x128xf32>
    %cst_69 = arith.constant dense<0.000000e+00> : vector<32x128xf32>
    %124 = tpu.matmul %122, %123, %cst_69 {dimension_numbers = #tpu.dot_dimension_numbers<[1], [0], [0], [1], [0, 0, 1, 1], [], []>} : vector<32x128xf32>, vector<128x128xf32>, vector<32x128xf32> -> vector<32x128xf32>
    %cst_70 = arith.constant 0.000000e+00 : f32
    %125 = vector.broadcast %cst_70 : f32 to vector<32x128xf32>
    %126 = arith.maximumf %124, %125 : vector<32x128xf32>
    %cst_71 = arith.constant dense<0.000000e+00> : vector<128xf32>
    %127 = vector.multi_reduction <add>, %126, %cst_71 [0] : vector<32x128xf32> to vector<128xf32>
    %128 = vector.shape_cast %127 : vector<128xf32> to vector<1x128xf32>
    %129 = arith.mulf %126, %126 : vector<32x128xf32>
    %cst_72 = arith.constant dense<0.000000e+00> : vector<128xf32>
    %130 = vector.multi_reduction <add>, %129, %cst_72 [0] : vector<32x128xf32> to vector<128xf32>
    %131 = vector.shape_cast %130 : vector<128xf32> to vector<1x128xf32>
    %c0_73 = arith.constant 0 : index
    %c0_74 = arith.constant 0 : index
    %132 = vector.load %arg6[%c0_73, %c0_74] : memref<128x128xf32, #tpu.memory_space<vmem>>, vector<128x128xf32>
    %cst_75 = arith.constant dense<0.000000e+00> : vector<1x128xf32>
    %133 = tpu.matmul %128, %132, %cst_75 {dimension_numbers = #tpu.dot_dimension_numbers<[1], [0], [0], [1], [0, 0, 1, 1], [], []>} : vector<1x128xf32>, vector<128x128xf32>, vector<1x128xf32> -> vector<1x128xf32>
    %cst_76 = arith.constant 0.001953125 : f32
    %134 = vector.broadcast %cst_76 : f32 to vector<1x128xf32>
    %135 = arith.mulf %133, %134 : vector<1x128xf32>
    %c0_77 = arith.constant 0 : index
    %c0_78 = arith.constant 0 : index
    %136 = vector.load %arg6[%c0_77, %c0_78] : memref<128x128xf32, #tpu.memory_space<vmem>>, vector<128x128xf32>
    %cst_79 = arith.constant dense<0.000000e+00> : vector<1x128xf32>
    %137 = tpu.matmul %131, %136, %cst_79 {dimension_numbers = #tpu.dot_dimension_numbers<[1], [0], [0], [1], [0, 0, 1, 1], [], []>} : vector<1x128xf32>, vector<128x128xf32>, vector<1x128xf32> -> vector<1x128xf32>
    %cst_80 = arith.constant 0.001953125 : f32
    %138 = vector.broadcast %cst_80 : f32 to vector<1x128xf32>
    %139 = arith.mulf %137, %138 : vector<1x128xf32>
    %140 = arith.mulf %135, %135 : vector<1x128xf32>
    %141 = arith.subf %139, %140 : vector<1x128xf32>
    %c0_81 = arith.constant 0 : index
    %c0_82 = arith.constant 0 : index
    %142 = vector.load %arg11[%c0_81, %c0_82] : memref<1x128xf32, #tpu.memory_space<vmem>>, vector<1x128xf32>
    %cst_83 = arith.constant 9.99999974E-6 : f32
    %143 = vector.broadcast %cst_83 : f32 to vector<1x128xf32>
    %144 = arith.addf %141, %143 : vector<1x128xf32>
    %145 = math.rsqrt %144 : vector<1x128xf32>
    %146 = arith.mulf %142, %145 : vector<1x128xf32>
    %c0_84 = arith.constant 0 : index
    %c0_85 = arith.constant 0 : index
    %147 = vector.load %arg12[%c0_84, %c0_85] : memref<1x128xf32, #tpu.memory_space<vmem>>, vector<1x128xf32>
    %148 = arith.mulf %135, %146 : vector<1x128xf32>
    %149 = arith.subf %147, %148 : vector<1x128xf32>
    %150 = vector.broadcast %146 : vector<1x128xf32> to vector<32x128xf32>
    %151 = arith.mulf %126, %150 : vector<32x128xf32>
    %152 = vector.broadcast %149 : vector<1x128xf32> to vector<32x128xf32>
    %153 = arith.addf %151, %152 : vector<32x128xf32>
    %c0_86 = arith.constant 0 : index
    %c0_87 = arith.constant 0 : index
    %154 = vector.load %arg13[%c0_86, %c0_87] : memref<32x128xf32, #tpu.memory_space<vmem>>, vector<32x128xf32>
    tpu.vector_store %arg13[%c0_86, %c0_87], %153 {strides = array<i32>} : memref<32x128xf32, #tpu.memory_space<vmem>>, vector<32x128xf32>,
    return
  }
  func.func @transform_0(%arg0: i32) -> (i32, i32) {
    %c0_i32 = arith.constant 0 : i32
    %c0_i32_0 = arith.constant 0 : i32
    %c0_i32_1 = arith.constant 0 : i32
    return %c0_i32, %c0_i32_0 : i32, i32
  }
  func.func @transform_1(%arg0: i32) -> (i32, i32) {
    %c0_i32 = arith.constant 0 : i32
    %c0_i32_0 = arith.constant 0 : i32
    %c0_i32_1 = arith.constant 0 : i32
    return %c0_i32, %c0_i32_0 : i32, i32
  }
  func.func @transform_2(%arg0: i32) -> (i32, i32, i32) {
    %c0_i32 = arith.constant 0 : i32
    %c0_i32_0 = arith.constant 0 : i32
    %c0_i32_1 = arith.constant 0 : i32
    %c0_i32_2 = arith.constant 0 : i32
    return %c0_i32, %c0_i32_0, %c0_i32_1 : i32, i32, i32
  }
  func.func @transform_3(%arg0: i32) -> (i32, i32) {
    %c0_i32 = arith.constant 0 : i32
    %c0_i32_0 = arith.constant 0 : i32
    %c0_i32_1 = arith.constant 0 : i32
    return %c0_i32, %c0_i32_0 : i32, i32
  }
  func.func @transform_4(%arg0: i32) -> (i32, i32) {
    %c0_i32 = arith.constant 0 : i32
    %c0_i32_0 = arith.constant 0 : i32
    %c0_i32_1 = arith.constant 0 : i32
    return %c0_i32, %c0_i32_0 : i32, i32
  }
  func.func @transform_5(%arg0: i32) -> (i32, i32) {
    %c0_i32 = arith.constant 0 : i32
    %c0_i32_0 = arith.constant 0 : i32
    %c0_i32_1 = arith.constant 0 : i32
    return %c0_i32, %c0_i32_0 : i32, i32
  }
  func.func @transform_6(%arg0: i32) -> (i32, i32) {
    %c0_i32 = arith.constant 0 : i32
    %c0_i32_0 = arith.constant 0 : i32
    %c0_i32_1 = arith.constant 0 : i32
    return %c0_i32, %c0_i32_0 : i32, i32
  }
  func.func @transform_7(%arg0: i32) -> (i32, i32) {
    %c0_i32 = arith.constant 0 : i32
    %c0_i32_0 = arith.constant 0 : i32
    %c0_i32_1 = arith.constant 0 : i32
    return %c0_i32, %c0_i32_0 : i32, i32
  }
  func.func @transform_8(%arg0: i32) -> (i32, i32) {
    %c0_i32 = arith.constant 0 : i32
    %c0_i32_0 = arith.constant 0 : i32
    %c0_i32_1 = arith.constant 0 : i32
    return %c0_i32, %c0_i32_0 : i32, i32
  }
  func.func @transform_9(%arg0: i32) -> (i32, i32) {
    %c0_i32 = arith.constant 0 : i32
    %c0_i32_0 = arith.constant 0 : i32
    %c0_i32_1 = arith.constant 0 : i32
    return %c0_i32, %c0_i32_0 : i32, i32
  }
  func.func @transform_10(%arg0: i32) -> (i32, i32) {
    %c0_i32 = arith.constant 0 : i32
    %c0_i32_0 = arith.constant 0 : i32
    %c0_i32_1 = arith.constant 0 : i32
    return %c0_i32, %c0_i32_0 : i32, i32
  }
  func.func @transform_11(%arg0: i32) -> (i32, i32) {
    %c0_i32 = arith.constant 0 : i32
    %c0_i32_0 = arith.constant 0 : i32
    %c0_i32_1 = arith.constant 0 : i32
    return %c0_i32, %c0_i32_0 : i32, i32
  }
  func.func @transform_12(%arg0: i32) -> (i32, i32) {
    %c0_i32 = arith.constant 0 : i32
    %c0_i32_0 = arith.constant 0 : i32
    %c0_i32_1 = arith.constant 0 : i32
    return %c0_i32, %c0_i32_0 : i32, i32
  }
}

</mosaic_0001>

<bundles_post_ra>
// kernel: tpu_custom_call.1
= control target key start
LH: loop header
LB: loop body
LE: loop exit
PB: predicated region body
PF: predicated region fallthrough
CT: control target
= control target key end

     0   :  { %17 = vsyncpa [#allocation4], 0  ;;  %s1386_s0 = inlined_call_operand.hbm [shape: f32[32,64], index: 0, kind: input, shape index: {}]   ;;  %s1387_s1 = inlined_call_operand.hbm [shape: f32[64,128], index: 1, kind: input, shape index: {}]   ;;  %s1388_s2 = inlined_call_operand.hbm [shape: f32[3,128,128], index: 2, kind: input, shape index: {}]   ;;  %s1389_s3 = inlined_call_operand.hbm [shape: f32[128,128], index: 3, kind: input, shape index: {}]   ;;  %s1390_s4 = inlined_call_operand.hbm [shape: f32[128,128], index: 4, kind: input, shape index: {}]   ;;  %s1391_s5 = inlined_call_operand.hbm [shape: f32[128,128], index: 5, kind: input, shape index: {}]   ;;  %s1392_s6 = inlined_call_operand.vmem [shape: f32[1,128], index: 6, kind: input, shape index: {}]   ;;  %s1393_s7 = inlined_call_operand.vmem [shape: f32[1,128], index: 7, kind: input, shape index: {}]   ;;  %s1394_s8 = inlined_call_operand.vmem [shape: f32[1,128], index: 8, kind: input, shape index: {}]   ;;  %s1395_s9 = inlined_call_operand.vmem [shape: f32[1,128], index: 9, kind: input, shape index: {}]   ;;  %s1396_s10 = inlined_call_operand.vmem [shape: f32[1,128], index: 10, kind: input, shape index: {}]   ;;  %s1397_s11 = inlined_call_operand.vmem [shape: f32[1,128], index: 11, kind: input, shape index: {}]   ;;  %s1398_s12 = inlined_call_operand.hbm [shape: f32[32,128], index: 12, kind: output, shape index: {}]  }
   0x1   :  { %18 = vsyncpa [#allocation7], 0 }
   0x2   :  { %19 = vsyncpa [#allocation10], 0 }
   0x3   :  { %20 = vsyncpa [#allocation13], 0 }
   0x4   :  { %21 = vsyncpa [#allocation5], 0  ;;  %s39_s23 = sshll.u32 %s1387_s1, 4  ;;  %s1082_s24 = smov [#allocation6]   ;;  %s40_s23 = int_to_ptr.hbm [resolvable:$true] %s39_s23 }
   0x5   :  { %s41_s25 = sshll.u32 %s1082_s24, 4  ;;  %s65_s28 = sshll.u32 %s1389_s3, 4  ;;  %s42_s25 = int_to_ptr.vmem [resolvable:$true] %s41_s25  ;;  %s66_s28 = int_to_ptr.hbm [resolvable:$true] %s65_s28 }
   0x6   :  { %s1083_s29 = smov 128   ;;  %s1084_s30 = smov 8  }
   0x7   :  { %47 = dma.hbm_to_vmem [thread:$0]  %s40_s23, 1024, %s42_s25, [#allocation7], %s1083_s29, %s1083_s29, %s1084_s30  }
   0x8   :  { %s1085_s13 = smov [#allocation9]   ;;  %s26_s1 = sshll.u32 %s1386_s0, 4  ;;  %s27_s1 = int_to_ptr.hbm [resolvable:$true] %s26_s1 }
   0x9   :  { %s67_s14 = sshll.u32 %s1085_s13, 4  ;;  %s52_s18 = sshll.u32 %s1388_s2, 4  ;;  %s68_s14 = int_to_ptr.vmem [resolvable:$true] %s67_s14  ;;  %s53_s18 = int_to_ptr.hbm [resolvable:$true] %s52_s18 }
   0xa   :  { %73 = dma.hbm_to_vmem [thread:$0]  %s66_s28, 2048, %s68_s14, [#allocation10], %s1083_s29, %s1083_s29, %s1084_s30  }
   0xb   :  { %s1086_s19 = smov [#allocation3]   ;;  %s1087_s21 = smov [#allocation8]  }
   0xc   :  { %s28_s20 = sshll.u32 %s1086_s19, 4  ;;  %s54_s0 = sshll.u32 %s1087_s21, 4  ;;  %s29_s20 = int_to_ptr.vmem [resolvable:$true] %s28_s20  ;;  %s55_s0 = int_to_ptr.vmem [resolvable:$true] %s54_s0 }
   0xd   :  { %34 = dma.hbm_to_vmem [thread:$0]  %s27_s1, 512, %s29_s20, [#allocation4], %s1083_s29, %s1083_s29, %s1084_s30  }
   0xe   :  { %s78_s24 = sshll.u32 %s1390_s4, 4  ;;  %s91_s26 = sshll.u32 %s1391_s5, 4  ;;  %s79_s24 = int_to_ptr.hbm [resolvable:$true] %s78_s24  ;;  %s92_s26 = int_to_ptr.hbm [resolvable:$true] %s91_s26 }
   0xf   :  { %60 = dma.hbm_to_vmem [thread:$0]  %s53_s18, 6144, %s55_s0, [#allocation7], %s1083_s29, %s1083_s29, %s1084_s30  }
  0x10   :  { %s1088_s27 = smov [#allocation11]   ;;  %s1089_s13 = smov [#allocation12]  }
  0x11   :  { %s80_s28 = sshll.u32 %s1088_s27, 4  ;;  %s93_s4 = sshll.u32 %s1089_s13, 4  ;;  %s81_s28 = int_to_ptr.vmem [resolvable:$true] %s80_s28  ;;  %s94_s4 = int_to_ptr.vmem [resolvable:$true] %s93_s4 }
  0x12   :  { %86 = dma.hbm_to_vmem [thread:$0]  %s79_s24, 2048, %s81_s28, [#allocation10], %s1083_s29, %s1083_s29, %s1084_s30  }
  0x13   :  { %99 = dma.hbm_to_vmem [thread:$0]  %s92_s26, 2048, %s94_s4, [#allocation13], %s1083_s29, %s1083_s29, %s1084_s30  }
  0x14   :  { %1072 = dma.done.wait [#allocation4], 512  }
  0x15   :  { %1073 = vsyncadd [#allocation4], 4294966784 }
  0x16   :  { %1074 = dma.done.wait [#allocation7], 7168  }
  0x17   :  { %1075 = vsyncadd [#allocation7], 4294960128 }
  0x18   :  { %1076 = dma.done.wait [#allocation10], 4096  }
  0x19   :  { %1077 = vsyncadd [#allocation10], 4294963200 }
  0x1a   :  { %1078 = dma.done.wait [#allocation13], 2048  }
  0x1b   :  { %1079 = vsyncadd [#allocation13], 4294965248  ;;  %v147_v0 = vld [vmem:[#allocation6 + $0x38] sm:$0xff]  ;;  %v146_v1 = vld [vmem:[#allocation6 + $0x30] sm:$0xff]  ;;  %vm148_vm0 = vcmask 523264   ;;  %s864_s0 = sshll.u32 %s1398_s12, 4  ;;  %s865_s0 = int_to_ptr.hbm [resolvable:$true] %s864_s0 }
  0x1c   :  { %169 = vmatpush.msra.mxu3 %v147_v0  ;;  %v145_v2 = vld [vmem:[#allocation6 + $0x28] sm:$0xff]  ;;  %v144_v3 = vld [vmem:[#allocation6 + $0x20] sm:$0xff]  ;;  %v143_v4 = vld [vmem:[#allocation6 + $0x18] sm:$0xff] }
  0x1d   :  { %v142_v5 = vld [vmem:[#allocation6 + $0x10] sm:$0xff]  ;;  %v141_v6 = vld [vmem:[#allocation6 + $0x8] sm:$0xff]  ;;  %v140_v7 = vld [vmem:[#allocation6] sm:$0xff] }
  0x1e   :  { %170 = vmatpush.msra.mxu3 %v146_v1  ;;  %v136_v8 = vld [vmem:[#allocation3] sm:$0xff]  ;;  %v137_v9 = vld [vmem:[#allocation3 + $0x8] sm:$0xff]  ;;  %v138_v10 = vld [vmem:[#allocation3 + $0x10] sm:$0xff] }
  0x1f   :  { %v139_v11 = vld [vmem:[#allocation3 + $0x18] sm:$0xff]  ;;  %v1197_v13 = vld [vmem:[#allocation11 + $0x70] sm:$0xff]  ;;  %v1201_v14 = vld [vmem:[#allocation11 + $0x68] sm:$0xff] }
  0x20   :  { %171 = vmatpush.msra.mxu3 %v145_v2  ;;  %v1193_v12 = vld [vmem:[#allocation11 + $0x78] sm:$0xff]  ;;  %v1205_v15 = vld [vmem:[#allocation11 + $0x60] sm:$0xff]  ;;  %v1213_v17 = vld [vmem:[#allocation11 + $0x50] sm:$0xff] }
  0x21   :  { %232 = vmatpush.msra.mxu1 %v1193_v12  ;;  %253 = vmatpush.msra.mxu2 %v1193_v12  ;;  %v1209_v16 = vld [vmem:[#allocation11 + $0x58] sm:$0xff]  ;;  %v1217_v18 = vld [vmem:[#allocation11 + $0x48] sm:$0xff]  ;;  %v1221_v19 = vld [vmem:[#allocation11 + $0x40] sm:$0xff] }
  0x22   :  { %172 = vmatpush.msra.mxu3 %v144_v3  ;;  %v1225_v20 = vld [vmem:[#allocation11 + $0x38] sm:$0xff]  ;;  %v1229_v21 = vld [vmem:[#allocation11 + $0x30] sm:$0xff]  ;;  %v1233_v22 = vld [vmem:[#allocation11 + $0x28] sm:$0xff] }
  0x23   :  { %233 = vmatpush.msra.mxu1 %v1197_v13  ;;  %254 = vmatpush.msra.mxu2 %v1197_v13  ;;  %v1235_v23 = vld [vmem:[#allocation11 + $0x20] sm:$0xff]  ;;  %v1239_v24 = vld [vmem:[#allocation11 + $0x18] sm:$0xff]  ;;  %v1243_v26 = vld [vmem:[#allocation11 + $0x10] sm:$0xff] }
  0x24   :  { %173 = vmatpush.msra.mxu3 %v143_v4  ;;  %v1247_v27 = vld [vmem:[#allocation11 + $0x8] sm:$0xff]  ;;  %v1251_v28 = vld [vmem:[#allocation11] sm:$0xff]  ;;  %v432_v58 = vld [vmem:[#allocation8 + $0xf8] sm:$0xff] }
  0x25   :  { %234 = vmatpush.msra.mxu1 %v1201_v14  ;;  %255 = vmatpush.msra.mxu2 %v1201_v14  ;;  %v431_v59 = vld [vmem:[#allocation8 + $0xf0] sm:$0xff]  ;;  %v430_v60 = vld [vmem:[#allocation8 + $0xe8] sm:$0xff]  ;;  %v429_v61 = vld [vmem:[#allocation8 + $0xe0] sm:$0xff] }
  0x26   :  { %174 = vmatpush.msra.mxu3 %v142_v5  ;;  %v428_v62 = vld [vmem:[#allocation8 + $0xd8] sm:$0xff]  ;;  %v427_v1 = vld [vmem:[#allocation8 + $0xd0] sm:$0xff]  ;;  %v426_v4 = vld [vmem:[#allocation8 + $0xc8] sm:$0xff] }
  0x27   :  { %235 = vmatpush.msra.mxu1 %v1205_v15  ;;  %256 = vmatpush.msra.mxu2 %v1205_v15  ;;  %v415_v63 = vld [vmem:[#allocation8 + $0x78] sm:$0xff]  ;;  %v414_v2 = vld [vmem:[#allocation8 + $0x70] sm:$0xff]  ;;  %v413_v5 = vld [vmem:[#allocation8 + $0x68] sm:$0xff] }
  0x28   :  { %175 = vmatpush.msra.mxu3 %v141_v6  ;;  %v539_v0 = vld [vmem:[#allocation8 + $0x178] sm:$0xff]  ;;  %462 = vmatpush.msra.mxu0 %v415_v63  ;;  %v538_v3 = vld [vmem:[#allocation8 + $0x170] sm:$0xff]  ;;  %v537_v6 = vld [vmem:[#allocation8 + $0x168] sm:$0xff] }
  0x29   :  { %236 = vmatpush.msra.mxu1 %v1209_v16  ;;  %257 = vmatpush.msra.mxu2 %v1209_v16  ;;  %v402_v63 = vld [vmem:[#allocation8 + $0x10] sm:$0xff] }
  0x2a   :  { %176 = vmatpush.msra.mxu3 %v140_v7  ;;  %463 = vmatpush.msra.mxu0 %v414_v2  ;;  %v425_v7 = vld [vmem:[#allocation8 + $0xc0] sm:$0xff]  ;;  %v401_v2 = vld [vmem:[#allocation8 + $0x8] sm:$0xff] }
  0x2b   :  { %880 = vmatmul.msk.f32.vlgmr.msra.gmra.mxu3 %vm148_vm0, %v136_v8  ;;  %237 = vmatpush.msra.mxu1 %v1213_v17  ;;  %v412_v8 = vld [vmem:[#allocation8 + $0x60] sm:$0xff] }
  0x2c   :  { %258 = vmatpush.msra.mxu2 %v1213_v17  ;;  %433 = vmatpush.msrb.mxu3 %v432_v58 }
  0x2d   :  { %238 = vmatpush.msra.mxu1 %v1217_v18  ;;  %464 = vmatpush.msra.mxu0 %v413_v5  ;;  %v524_v5 = vld [vmem:[#allocation8 + $0x100] sm:$0xff] }
  0x2e   :  { %259 = vmatpush.msra.mxu2 %v1217_v18  ;;  %434 = vmatpush.msrb.mxu3 %v431_v59  ;;  %v1090_v59 = vmov 0.0  }
  0x2f   :  { %239 = vmatpush.msra.mxu1 %v1221_v19  ;;  %465 = vmatpush.msra.mxu0 %v412_v8  ;;  %306 = vst [vmem:[#allocation2] sm:$0xff] %v1090_v59 }
  0x30   :  { %260 = vmatpush.msra.mxu2 %v1221_v19  ;;  %435 = vmatpush.msrb.mxu3 %v430_v60  ;;  %307 = vst [vmem:[#allocation2 + $0x8] sm:$0xff] %v1090_v59 }
  0x31   :  { %240 = vmatpush.msra.mxu1 %v1225_v20  ;;  %308 = vst [vmem:[#allocation2 + $0x10] sm:$0xff] %v1090_v59 }
  0x32   :  { %261 = vmatpush.msra.mxu2 %v1225_v20  ;;  %436 = vmatpush.msrb.mxu3 %v429_v61  ;;  %v403_v61 = vld [vmem:[#allocation8 + $0x18] sm:$0xff]  ;;  %309 = vst [vmem:[#allocation2 + $0x18] sm:$0xff] %v1090_v59 }
  0x33   :  { %881 = vmatmul.msk.f32.gmra.mxu3 %vm148_vm0, %v137_v9  ;;  %241 = vmatpush.msra.mxu1 %v1229_v21  ;;  %v536_v9 = vld [vmem:[#allocation8 + $0x160] sm:$0xff]  ;;  %310 = vst [vmem:[#allocation2 + $0x20] sm:$0x3] %v1090_v59 }
  0x34   :  { %262 = vmatpush.msra.mxu2 %v1229_v21  ;;  %437 = vmatpush.msrb.mxu3 %v428_v62  ;;  %v527_v62 = vld [vmem:[#allocation8 + $0x118] sm:$0xff] }
  0x35   :  { %242 = vmatpush.msra.mxu1 %v1233_v22 }
  0x36   :  { %263 = vmatpush.msra.mxu2 %v1233_v22  ;;  %438 = vmatpush.msrb.mxu3 %v427_v1 }
  0x37   :  { %243 = vmatpush.msra.mxu1 %v1235_v23 }
  0x38   :  { %264 = vmatpush.msra.mxu2 %v1235_v23  ;;  %439 = vmatpush.msrb.mxu3 %v426_v4  ;;  %v400_v4 = vld [vmem:[#allocation8] sm:$0xff] }
  0x39   :  { %244 = vmatpush.msra.mxu1 %v1239_v24 }
  0x3a   :  { %265 = vmatpush.msra.mxu2 %v1239_v24  ;;  %440 = vmatpush.msrb.mxu3 %v425_v7 }
  0x3b   :  { %882 = vmatmul.msk.f32.gmra.mxu3 %vm148_vm0, %v138_v10  ;;  %245 = vmatpush.msra.mxu1 %v1243_v26  ;;  %v424_v10 = vld [vmem:[#allocation8 + $0xb8] sm:$0xff] }
  0x3c   :  { %266 = vmatpush.msra.mxu2 %v1243_v26  ;;  %441 = vmatpush.msrb.mxu3 %v424_v10 }
  0x3d   :  { %246 = vmatpush.msra.mxu1 %v1247_v27 }
  0x3e   :  { %267 = vmatpush.msra.mxu2 %v1247_v27 }
  0x3f   :  { %247 = vmatpush.msra.mxu1 %v1251_v28 }
  0x40   :  { %268 = vmatpush.msra.mxu2 %v1251_v28 }
  0x41   :  { %540 = vmatpush.msrb.mxu1 %v539_v0  ;;  %v526_v0 = vld [vmem:[#allocation8 + $0x110] sm:$0xff] }
  0x42   :  { %615 = vmatpush.msrb.mxu2 %v1193_v12 }
  0x43   :  { %883 = vmatmul.msk.f32.gmra.mxu3 %vm148_vm0, %v139_v11  ;;  %541 = vmatpush.msrb.mxu1 %v538_v3  ;;  %v411_v11 = vld [vmem:[#allocation8 + $0x58] sm:$0xff]  ;;  %v525_v3 = vld [vmem:[#allocation8 + $0x108] sm:$0xff] }
  0x44   :  { %616 = vmatpush.msrb.mxu2 %v1197_v13  ;;  %466 = vmatpush.msra.mxu0 %v411_v11 }
  0x45   :  { %542 = vmatpush.msrb.mxu1 %v537_v6 }
  0x46   :  { %617 = vmatpush.msrb.mxu2 %v1201_v14 }
  0x47   :  { %543 = vmatpush.msrb.mxu1 %v536_v9 }
  0x48   :  { %618 = vmatpush.msrb.mxu2 %v1205_v15 }
  0x4a   :  { %619 = vmatpush.msrb.mxu2 %v1209_v16 }
  0x4c   :  { %620 = vmatpush.msrb.mxu2 %v1213_v17 }
  0x4e   :  { %621 = vmatpush.msrb.mxu2 %v1217_v18 }
  0x50   :  { %622 = vmatpush.msrb.mxu2 %v1221_v19 }
  0x52   :  { %623 = vmatpush.msrb.mxu2 %v1225_v20 }
  0x54   :  { %624 = vmatpush.msrb.mxu2 %v1229_v21 }
  0x56   :  { %625 = vmatpush.msrb.mxu2 %v1233_v22 }
  0x58   :  { %626 = vmatpush.msrb.mxu2 %v1235_v23 }
  0x5a   :  { %627 = vmatpush.msrb.mxu2 %v1239_v24 }
  0x5c   :  { %628 = vmatpush.msrb.mxu2 %v1243_v26 }
  0x5e   :  { %629 = vmatpush.msrb.mxu2 %v1247_v27 }
  0x60   :  { %630 = vmatpush.msrb.mxu2 %v1251_v28 }
  0xae   :  { %v178_v25 = vpop.f32.mrf.mxu3 }
  0xaf   :  { %v1264_v32 = vmax.f32 %v178_v25, 0.0  ;;  %v535_v25 = vld [vmem:[#allocation8 + $0x158] sm:$0xff] }
  0xb0   :  { %544 = vmatpush.msrb.mxu1 %v535_v25 }
  0xb1   :  { %v203_v35 = vmul.f32 %v1264_v32, %v1264_v32 }
  0xb6   :  { %v181_v29 = vpop.f32.mrf.mxu3 }
  0xb7   :  { %v1261_v31 = vmax.f32 %v181_v29, 0.0  ;;  %v423_v29 = vld [vmem:[#allocation8 + $0xb0] sm:$0xff] }
  0xb8   :  { %442 = vmatpush.msrb.mxu3 %v423_v29 }
  0xb9   :  { %v204_v34 = vmul.f32 %v1261_v31, %v1261_v31  ;;  %v194_v36 = vadd.f32 %v1261_v31, %v1264_v32 }
  0xbb   :  { %v207_v39 = vadd.f32 %v204_v34, %v203_v35  ;;  %v534_v34 = vld [vmem:[#allocation8 + $0x150] sm:$0xff]  ;;  %v422_v35 = vld [vmem:[#allocation8 + $0xa8] sm:$0xff] }
  0xbc   :  { %545 = vmatpush.msrb.mxu1 %v534_v34  ;;  %443 = vmatpush.msrb.mxu3 %v422_v35 }
  0xbe   :  { %v184_v30 = vpop.f32.mrf.mxu3 }
  0xbf   :  { %v1266_v33 = vmax.f32 %v184_v30, 0.0  ;;  %v410_v30 = vld [vmem:[#allocation8 + $0x50] sm:$0xff] }
  0xc0   :  { %467 = vmatpush.msra.mxu0 %v410_v30 }
  0xc1   :  { %v205_v37 = vmul.f32 %v1266_v33, %v1266_v33  ;;  %v195_v40 = vadd.f32 %v194_v36, %v1266_v33  ;;  %v409_v36 = vld [vmem:[#allocation8 + $0x48] sm:$0xff] }
  0xc2   :  { %468 = vmatpush.msra.mxu0 %v409_v36 }
  0xc3   :  { %v208_v42 = vadd.f32 %v207_v39, %v205_v37  ;;  %v533_v37 = vld [vmem:[#allocation8 + $0x148] sm:$0xff]  ;;  %v408_v39 = vld [vmem:[#allocation8 + $0x40] sm:$0xff] }
  0xc4   :  { %546 = vmatpush.msrb.mxu1 %v533_v37  ;;  %469 = vmatpush.msra.mxu0 %v408_v39 }
  0xc6   :  { %v187_v38 = vpop.f32.mrf.mxu3 }
  0xc7   :  { %v1280_v41 = vmax.f32 %v187_v38, 0.0  ;;  %v421_v38 = vld [vmem:[#allocation8 + $0xa0] sm:$0xff] }
  0xc8   :  { %444 = vmatpush.msrb.mxu3 %v421_v38 }
  0xc9   :  { %v196_v43 = vadd.f32 %v195_v40, %v1280_v41  ;;  %v206_v44 = vmul.f32 %v1280_v41, %v1280_v41  ;;  %v532_v40 = vld [vmem:[#allocation8 + $0x140] sm:$0xff] }
  0xca   :  { %547 = vmatpush.msrb.mxu1 %v532_v40 }
  0xcb   :  { %v197_v45 = vrot.slane %v196_v43, 4  ;;  %v209_v46 = vadd.f32 %v208_v42, %v206_v44  ;;  %v407_v44 = vld [vmem:[#allocation8 + $0x38] sm:$0xff] }
  0xcc   :  { %470 = vmatpush.msra.mxu0 %v407_v44 }
  0xcd   :  { %v198_v47 = vadd.f32 %v197_v45, %v196_v43  ;;  %v210_v48 = vrot.slane %v209_v46, 4  ;;  %v420_v43 = vld [vmem:[#allocation8 + $0x98] sm:$0xff] }
  0xce   :  { %v531_v45 = vld [vmem:[#allocation8 + $0x138] sm:$0xff]  ;;  %445 = vmatpush.msrb.mxu3 %v420_v43 }
  0xcf   :  { %v199_v49 = vrot.slane %v198_v47, 2  ;;  %v211_v50 = vadd.f32 %v210_v48, %v209_v46  ;;  %v419_v46 = vld [vmem:[#allocation8 + $0x90] sm:$0xff]  ;;  %548 = vmatpush.msrb.mxu1 %v531_v45 }
  0xd0   :  { %v530_v48 = vld [vmem:[#allocation8 + $0x130] sm:$0xff]  ;;  %446 = vmatpush.msrb.mxu3 %v419_v46 }
  0xd1   :  { %v200_v51 = vadd.f32 %v199_v49, %v198_v47  ;;  %v212_v52 = vrot.slane %v211_v50, 2  ;;  %v406_v47 = vld [vmem:[#allocation8 + $0x30] sm:$0xff]  ;;  %549 = vmatpush.msrb.mxu1 %v530_v48 }
  0xd2   :  { %471 = vmatpush.msra.mxu0 %v406_v47 }
  0xd3   :  { %v201_v53 = vrot.slane %v200_v51, 1  ;;  %v213_v54 = vadd.f32 %v212_v52, %v211_v50  ;;  %v418_v50 = vld [vmem:[#allocation8 + $0x88] sm:$0xff] }
  0xd4   :  { %v529_v52 = vld [vmem:[#allocation8 + $0x128] sm:$0xff]  ;;  %447 = vmatpush.msrb.mxu3 %v418_v50 }
  0xd5   :  { %v202_v55 = vadd.f32 %v201_v53, %v200_v51  ;;  %v214_v56 = vrot.slane %v213_v54, 1  ;;  %v405_v51 = vld [vmem:[#allocation8 + $0x28] sm:$0xff]  ;;  %v417_v53 = vld [vmem:[#allocation8 + $0x80] sm:$0xff]  ;;  %550 = vmatpush.msrb.mxu1 %v529_v52 }
  0xd6   :  { %472 = vmatpush.msra.mxu0 %v405_v51  ;;  %448 = vmatpush.msrb.mxu3 %v417_v53 }
  0xd7   :  { %248 = vmatmul.f32.vlgmr.msra.gmra.mxu1 %v202_v55  ;;  %v215_v57 = vadd.f32 %v214_v56, %v213_v54  ;;  %v404_v54 = vld [vmem:[#allocation8 + $0x20] sm:$0xff] }
  0xd8   :  { %v528_v56 = vld [vmem:[#allocation8 + $0x120] sm:$0xff]  ;;  %473 = vmatpush.msra.mxu0 %v404_v54  ;;  %636 = vmatpush.msra.mxu3 %v1193_v12 }
  0xd9   :  { %269 = vmatmul.f32.vlgmr.msra.gmra.mxu2 %v215_v57  ;;  %551 = vmatpush.msrb.mxu1 %v528_v56 }
  0xda   :  { %474 = vmatpush.msra.mxu0 %v403_v61  ;;  %637 = vmatpush.msra.mxu3 %v1197_v13 }
  0xdb   :  { %552 = vmatpush.msrb.mxu1 %v527_v62 }
  0xdc   :  { %475 = vmatpush.msra.mxu0 %v402_v63  ;;  %638 = vmatpush.msra.mxu3 %v1201_v14 }
  0xdd   :  { %553 = vmatpush.msrb.mxu1 %v526_v0 }
  0xde   :  { %476 = vmatpush.msra.mxu0 %v401_v2  ;;  %639 = vmatpush.msra.mxu3 %v1205_v15  ;;  %v276_v15 = vld [vmem:[%s1392_s6] sm:$0x1] }
  0xdf   :  { %554 = vmatpush.msrb.mxu1 %v525_v3 }
  0xe0   :  { %477 = vmatpush.msra.mxu0 %v400_v4  ;;  %640 = vmatpush.msra.mxu3 %v1209_v16 }
  0xe1   :  { %555 = vmatpush.msrb.mxu1 %v524_v5 }
  0xe2   :  { %641 = vmatpush.msra.mxu3 %v1213_v17 }
  0xe4   :  { %642 = vmatpush.msra.mxu3 %v1217_v18  ;;  %v315_v18 = vlaneseq }
  0xe6   :  { %643 = vmatpush.msra.mxu3 %v1221_v19  ;;  %v289_v19 = vld [vmem:[%s1393_s7] sm:$0x1]  ;;  %v316_v9 = vshrl.u32 %v315_v18, 7 }
  0xe8   :  { %644 = vmatpush.msra.mxu3 %v1225_v20  ;;  %v324_v29 = vand.u32 15, %v316_v9 }
  0xea   :  { %645 = vmatpush.msra.mxu3 %v1229_v21 }
  0xec   :  { %646 = vmatpush.msra.mxu3 %v1233_v22 }
  0xee   :  { %647 = vmatpush.msra.mxu3 %v1235_v23 }
  0xf0   :  { %648 = vmatpush.msra.mxu3 %v1239_v24 }
  0xf2   :  { %649 = vmatpush.msra.mxu3 %v1243_v26 }
  0xf4   :  { %650 = vmatpush.msra.mxu3 %v1247_v27  ;;  %v372_v27 = vadd.s32 4294967295, %v324_v29 }
  0xf6   :  { %651 = vmatpush.msra.mxu3 %v1251_v28  ;;  %vm376_vm4 = vcmp.ge.s32.totalorder %v372_v27, 0 }
 0x154   :  { %v249_v42 = vpop.f32.mrf.mxu1 }
 0x155   :  { %v1293_v49 = vmul.f32 0.001953125, %v249_v42  ;;  %v319_v42 = vadd.s32 24, %v316_v9 }
 0x157   :  { %v274_v57 = vmul.f32 %v1293_v49, %v1293_v49  ;;  %v345_v43 = vand.u32 15, %v319_v42  ;;  %v701_v42 = vld [vmem:[#allocation9 + $0x40] sm:$0xff] }
 0x159   :  { %v498_v46 = vadd.s32 1, %v345_v43  ;;  %v700_v43 = vld [vmem:[#allocation9 + $0x38] sm:$0xff] }
 0x15b   :  { %vm506_vm7 = vcmp.lt.s32.totalorder %v498_v46, 16  ;;  %v697_v46 = vld [vmem:[#allocation9 + $0x20] sm:$0xff] }
 0x15c   :  { %v270_v55 = vpop.f32.mrf.mxu2 }
 0x15d   :  { %v273_v58 = vmul.f32 0.001953125, %v270_v55 }
 0x15f   :  { %v275_v60 = vsub.f32 %v273_v58, %v274_v57 }
 0x161   :  { %v277_v1 = vadd.f32 1e-05, %v275_v60 }
 0x163   :  { %898 = vrsqrt.f32 %v277_v1  ;;  %vm284_vm2 = vweird.f32 %v277_v1 }
 0x169   :  { %v899_v12 = vpop.eup %898 }
 0x16a   :  { %v279_v13 = vmul.f32 %v899_v12, %v277_v1  ;;  %vm285_vm1 = vweird.f32 %v899_v12 }
 0x16b   :  { %vm286_vm3 = vmor %vm284_vm2, %vm285_vm1 }
 0x16c   :  { %v280_v6 = vmul.f32 %v899_v12, %v279_v13 }
 0x16e   :  { %v281_v7 = vmul.f32 0.5, %v280_v6 }
 0x170   :  { %v282_v14 = vsub.f32 1.5, %v281_v7 }
 0x172   :  { %v283_v16 = vmul.f32 %v899_v12, %v282_v14 }
 0x174   :  { %v287_v17 = vsel %vm286_vm3, %v899_v12, %v283_v16 }
 0x175   :  { %v288_v8 = vmul.f32 %v287_v17, %v276_v15 }
 0x177   :  { %v290_v20 = vmul.f32 %v288_v8, %v1293_v49  ;;  %v293_v21 = vperm.slane %v288_v8, 0 }
 0x179   :  { %v291_v10 = vsub.f32 %v289_v19, %v290_v20  ;;  %v295_v22 = vmul.f32 %v293_v21, %v1264_v32  ;;  %v296_v25 = vmul.f32 %v293_v21, %v1261_v31  ;;  %v297_v23 = vmul.f32 %v293_v21, %v1266_v33 }
 0x17a   :  { %v298_v30 = vmul.f32 %v293_v21, %v1280_v41  ;;  %v317_v31 = vadd.s32 8, %v316_v9  ;;  %v318_v41 = vadd.s32 16, %v316_v9 }
 0x17b   :  { %v300_v11 = vperm.slane %v291_v10, 0 }
 0x17c   :  { %v331_v32 = vand.u32 15, %v317_v31  ;;  %v338_v37 = vand.u32 15, %v318_v41  ;;  %v707_v41 = vld [vmem:[#allocation9 + $0x70] sm:$0xff] }
 0x17d   :  { %v1323_v34 = vadd.f32 %v300_v11, %v295_v22  ;;  %v1325_v35 = vadd.f32 %v300_v11, %v296_v25  ;;  %v1327_v24 = vadd.f32 %v300_v11, %v297_v23  ;;  %v1330_v26 = vadd.f32 %v300_v11, %v298_v30 }
 0x17e   :  { %v496_v36 = vadd.s32 1, %v331_v32  ;;  %v374_v40 = vadd.s32 4294967295, %v338_v37  ;;  %v705_v37 = vld [vmem:[#allocation9 + $0x60] sm:$0xff] }
 0x17f   :  { %311 = vst [vmem:[#allocation2 + $0x1] sm:$0xff] %v1323_v34  ;;  %449 = vmatmul.f32.vlgmr.msrb.gmra.mxu3 %v1323_v34 }
 0x180   :  { %312 = vst [vmem:[#allocation2 + $0x9] sm:$0xff] %v1325_v35  ;;  %vm504_vm5 = vcmp.lt.s32.totalorder %v496_v36, 16  ;;  %vm378_vm6 = vcmp.ge.s32.totalorder %v374_v40, 0  ;;  %v706_v36 = vld [vmem:[#allocation9 + $0x68] sm:$0xff] }
 0x181   :  { %313 = vst [vmem:[#allocation2 + $0x11] sm:$0xff] %v1327_v24  ;;  %v702_v40 = vld [vmem:[#allocation9 + $0x48] sm:$0xff] }
 0x182   :  { %314 = vst [vmem:[#allocation2 + $0x19] sm:$0xff] %v1330_v26 }
 0x186   :  { %v368_v33 = vld [vmem:[#allocation2] sm:$0xff] }
 0x187   :  { %452 = vmatmul.f32.gmra.mxu3 %v1325_v35  ;;  %884 = vmatmul.msk.f32.vlgmr.msra.gmra.mxu0 %vm376_vm4, %v368_v33  ;;  %v491_v28 = vld [vmem:[#allocation2 + $0x2] sm:$0xff] }
 0x188   :  { %556 = vmatmul.f32.vlgmr.msrb.gmra.mxu1 %v491_v28  ;;  %v369_v38 = vld [vmem:[#allocation2 + $0x8] sm:$0xff]  ;;  %v370_v44 = vld [vmem:[#allocation2 + $0x10] sm:$0xff]  ;;  %v708_v28 = vld [vmem:[#allocation9 + $0x78] sm:$0xff] }
 0x189   :  { %v492_v39 = vld [vmem:[#allocation2 + $0xa] sm:$0xff]  ;;  %v493_v45 = vld [vmem:[#allocation2 + $0x12] sm:$0xff]  ;;  %v494_v48 = vld [vmem:[#allocation2 + $0x1a] sm:$0xff]  ;;  %709 = vmatpush.msrb.mxu0 %v708_v28 }
 0x18a   :  { %v371_v47 = vld [vmem:[#allocation2 + $0x18] sm:$0xff]  ;;  %v765_v28 = vld [vmem:[#allocation12 + $0x8] sm:$0xff] }
 0x18b   :  { %710 = vmatpush.msrb.mxu0 %v707_v41 }
 0x18d   :  { %711 = vmatpush.msrb.mxu0 %v706_v36  ;;  %v764_v36 = vld [vmem:[#allocation12] sm:$0xff] }
 0x18f   :  { %455 = vmatmul.f32.gmra.mxu3 %v1327_v24  ;;  %481 = vmatmul.f32.gmra.mxu0 %v369_v38  ;;  %v704_v38 = vld [vmem:[#allocation9 + $0x58] sm:$0xff] }
 0x190   :  { %886 = vmatmul.msk.f32.gmra.mxu1 %vm504_vm5, %v492_v39  ;;  %712 = vmatpush.msrb.mxu0 %v705_v37  ;;  %v703_v39 = vld [vmem:[#allocation9 + $0x50] sm:$0xff] }
 0x192   :  { %713 = vmatpush.msrb.mxu0 %v704_v38 }
 0x194   :  { %714 = vmatpush.msrb.mxu0 %v703_v39 }
 0x196   :  { %715 = vmatpush.msrb.mxu0 %v702_v40 }
 0x197   :  { %458 = vmatmul.f32.gmra.mxu3 %v1330_v26  ;;  %885 = vmatmul.msk.f32.gmra.mxu0 %vm378_vm6, %v370_v44  ;;  %v699_v44 = vld [vmem:[#allocation9 + $0x30] sm:$0xff] }
 0x198   :  { %562 = vmatmul.f32.gmra.mxu1 %v493_v45  ;;  %716 = vmatpush.msrb.mxu0 %v701_v42  ;;  %v698_v45 = vld [vmem:[#allocation9 + $0x28] sm:$0xff] }
 0x19a   :  { %717 = vmatpush.msrb.mxu0 %v700_v43 }
 0x19c   :  { %718 = vmatpush.msrb.mxu0 %v699_v44 }
 0x19e   :  { %719 = vmatpush.msrb.mxu0 %v698_v45 }
 0x19f   :  { %487 = vmatmul.f32.gmra.mxu0 %v371_v47 }
 0x1a0   :  { %887 = vmatmul.msk.f32.gmra.mxu1 %vm506_vm7, %v494_v48  ;;  %v696_v48 = vld [vmem:[#allocation9 + $0x18] sm:$0xff]  ;;  %720 = vmatpush.msrb.mxu0 %v697_v46 }
 0x1a2   :  { %721 = vmatpush.msrb.mxu0 %v696_v48 }
 0x202   :  { %v450_v49 = vpop.f32.mrf.mxu3 }
 0x204   :  { %v479_v50 = vpop.f32.mrf.mxu0 }
 0x205   :  { %v557_v51 = vpop.f32.mrf.mxu1  ;;  %v480_v57 = vadd.f32 %v479_v50, %v450_v49 }
 0x207   :  { %v569_v62 = vadd.f32 %v557_v51, %v480_v57  ;;  %v695_v51 = vld [vmem:[#allocation9 + $0x10] sm:$0xff] }
 0x208   :  { %722 = vmatpush.msrb.mxu0 %v695_v51 }
 0x209   :  { %v1342_v1 = vmax.f32 %v569_v62, 0.0 }
 0x20a   :  { %v453_v52 = vpop.f32.mrf.mxu3 }
 0x20b   :  { %v586_v6 = vmul.f32 %v1342_v1, %v1342_v1 }
 0x20c   :  { %v482_v53 = vpop.f32.mrf.mxu0 }
 0x20d   :  { %v560_v54 = vpop.f32.mrf.mxu1  ;;  %v483_v55 = vadd.f32 %v482_v53, %v453_v52 }
 0x20f   :  { %v570_v59 = vadd.f32 %v560_v54, %v483_v55  ;;  %v694_v54 = vld [vmem:[#allocation9 + $0x8] sm:$0xff] }
 0x210   :  { %723 = vmatpush.msrb.mxu0 %v694_v54 }
 0x211   :  { %v1340_v0 = vmax.f32 %v570_v59, 0.0 }
 0x212   :  { %v456_v56 = vpop.f32.mrf.mxu3 }
 0x213   :  { %v587_v5 = vmul.f32 %v1340_v0, %v1340_v0  ;;  %v577_v7 = vadd.f32 %v1340_v0, %v1342_v1 }
 0x214   :  { %v485_v58 = vpop.f32.mrf.mxu0 }
 0x215   :  { %v486_v60 = vadd.f32 %v485_v58, %v456_v56  ;;  %v563_v61 = vpop.f32.mrf.mxu1  ;;  %v590_v16 = vadd.f32 %v587_v5, %v586_v6  ;;  %v693_v56 = vld [vmem:[#allocation9] sm:$0xff] }
 0x216   :  { %724 = vmatpush.msrb.mxu0 %v693_v56 }
 0x217   :  { %v571_v63 = vadd.f32 %v563_v61, %v486_v60 }
 0x219   :  { %v1344_v2 = vmax.f32 %v571_v63, 0.0  ;;  %v659_v63 = vld [vmem:[%s1394_s8] sm:$0x1] }
 0x21a   :  { %v459_v3 = vpop.f32.mrf.mxu3 }
 0x21b   :  { %v588_v14 = vmul.f32 %v1344_v2, %v1344_v2  ;;  %v578_v17 = vadd.f32 %v577_v7, %v1344_v2 }
 0x21c   :  { %v488_v4 = vpop.f32.mrf.mxu0 }
 0x21d   :  { %v489_v12 = vadd.f32 %v488_v4, %v459_v3  ;;  %v566_v13 = vpop.f32.mrf.mxu1  ;;  %v591_v8 = vadd.f32 %v590_v16, %v588_v14 }
 0x21f   :  { %v572_v15 = vadd.f32 %v566_v13, %v489_v12  ;;  %v672_v12 = vld [vmem:[%s1395_s9] sm:$0x1] }
 0x221   :  { %v1355_v18 = vmax.f32 %v572_v15, 0.0 }
 0x223   :  { %v579_v19 = vadd.f32 %v578_v17, %v1355_v18  ;;  %v589_v20 = vmul.f32 %v1355_v18, %v1355_v18 }
 0x225   :  { %v580_v21 = vrot.slane %v579_v19, 4  ;;  %v592_v9 = vadd.f32 %v591_v8, %v589_v20 }
 0x227   :  { %v581_v10 = vadd.f32 %v580_v21, %v579_v19  ;;  %v593_v22 = vrot.slane %v592_v9, 4 }
 0x229   :  { %v594_v11 = vadd.f32 %v593_v22, %v592_v9  ;;  %v582_v25 = vrot.slane %v581_v10, 2 }
 0x22b   :  { %v583_v23 = vadd.f32 %v582_v25, %v581_v10  ;;  %v595_v29 = vrot.slane %v594_v11, 2  ;;  %v778_v25 = vld [vmem:[#allocation12 + $0x70] sm:$0xff] }
 0x22d   :  { %v584_v30 = vrot.slane %v583_v23, 1  ;;  %v596_v27 = vadd.f32 %v595_v29, %v594_v11  ;;  %v770_v29 = vld [vmem:[#allocation12 + $0x30] sm:$0xff] }
 0x22f   :  { %v585_v31 = vadd.f32 %v584_v30, %v583_v23  ;;  %v597_v32 = vrot.slane %v596_v27, 1  ;;  %v771_v23 = vld [vmem:[#allocation12 + $0x38] sm:$0xff] }
 0x231   :  { %631 = vmatmul.f32.vlgmr.msrb.gmra.mxu2 %v585_v31  ;;  %v598_v33 = vadd.f32 %v597_v32, %v596_v27  ;;  %v769_v27 = vld [vmem:[#allocation12 + $0x28] sm:$0xff]  ;;  %v768_v31 = vld [vmem:[#allocation12 + $0x20] sm:$0xff]  ;;  %v767_v32 = vld [vmem:[#allocation12 + $0x18] sm:$0xff] }
 0x233   :  { %652 = vmatmul.f32.vlgmr.msra.gmra.mxu3 %v598_v33  ;;  %v766_v33 = vld [vmem:[#allocation12 + $0x10] sm:$0xff] }
 0x2b4   :  { %v632_v47 = vpop.f32.mrf.mxu2 }
 0x2b5   :  { %v635_v49 = vmul.f32 0.001953125, %v632_v47 }
 0x2b6   :  { %v653_v50 = vpop.f32.mrf.mxu3 }
 0x2b7   :  { %v657_v52 = vmul.f32 %v635_v49, %v635_v49  ;;  %v656_v53 = vmul.f32 0.001953125, %v653_v50 }
 0x2b9   :  { %v658_v55 = vsub.f32 %v656_v53, %v657_v52 }
 0x2bb   :  { %v660_v57 = vadd.f32 1e-05, %v658_v55 }
 0x2bd   :  { %900 = vrsqrt.f32 %v660_v57  ;;  %vm667_vm9 = vweird.f32 %v660_v57 }
 0x2c3   :  { %v901_v58 = vpop.eup %900 }
 0x2c4   :  { %v662_v59 = vmul.f32 %v901_v58, %v660_v57  ;;  %vm668_vm8 = vweird.f32 %v901_v58 }
 0x2c5   :  { %vm669_vm10 = vmor %vm667_vm9, %vm668_vm8 }
 0x2c6   :  { %v663_v60 = vmul.f32 %v901_v58, %v662_v59 }
 0x2c8   :  { %v664_v61 = vmul.f32 0.5, %v663_v60 }
 0x2ca   :  { %v665_v62 = vsub.f32 1.5, %v664_v61 }
 0x2cc   :  { %v666_v3 = vmul.f32 %v901_v58, %v665_v62 }
 0x2ce   :  { %v670_v4 = vsel %vm669_vm10, %v901_v58, %v666_v3 }
 0x2cf   :  { %v671_v5 = vmul.f32 %v670_v4, %v659_v63 }
 0x2d1   :  { %v673_v13 = vmul.f32 %v671_v5, %v635_v49  ;;  %v676_v6 = vperm.slane %v671_v5, 0 }
 0x2d3   :  { %v674_v7 = vsub.f32 %v672_v12, %v673_v13  ;;  %v678_v14 = vmul.f32 %v676_v6, %v1342_v1  ;;  %v679_v8 = vmul.f32 %v676_v6, %v1340_v0  ;;  %v680_v21 = vmul.f32 %v676_v6, %v1344_v2  ;;  %v777_v0 = vld [vmem:[#allocation12 + $0x68] sm:$0xff]  ;;  %v774_v2 = vld [vmem:[#allocation12 + $0x50] sm:$0xff] }
 0x2d4   :  { %v681_v22 = vmul.f32 %v676_v6, %v1355_v18  ;;  %v773_v18 = vld [vmem:[#allocation12 + $0x48] sm:$0xff] }
 0x2d5   :  { %v683_v15 = vperm.slane %v674_v7, 0 }
 0x2d7   :  { %v685_v16 = vadd.f32 %v683_v15, %v678_v14  ;;  %v686_v19 = vadd.f32 %v683_v15, %v679_v8  ;;  %v687_v9 = vadd.f32 %v683_v15, %v680_v21  ;;  %v688_v1 = vadd.f32 %v683_v15, %v681_v22  ;;  %v824_v21 = vld [vmem:[%s1396_s10] sm:$0x1]  ;;  %s1091_s10 = smov [#allocation14]  }
 0x2d8   :  { %s862_s19 = sshll.u32 %s1091_s10, 4  ;;  %s863_s19 = int_to_ptr.vmem [resolvable:$true] %s862_s19 }
 0x2d9   :  { %v689_v17 = vadd.f32 %v685_v16, %v1323_v34  ;;  %v690_v20 = vadd.f32 %v686_v19, %v1325_v35  ;;  %v691_v10 = vadd.f32 %v687_v9, %v1327_v24  ;;  %v692_v11 = vadd.f32 %v688_v1, %v1330_v26  ;;  %v779_v34 = vld [vmem:[#allocation12 + $0x78] sm:$0xff]  ;;  %v776_v35 = vld [vmem:[#allocation12 + $0x60] sm:$0xff] }
 0x2da   :  { %780 = vmatpush.msra.mxu1 %v779_v34  ;;  %801 = vmatpush.msra.mxu2 %v779_v34  ;;  %v775_v24 = vld [vmem:[#allocation12 + $0x58] sm:$0xff]  ;;  %v772_v26 = vld [vmem:[#allocation12 + $0x40] sm:$0xff] }
 0x2db   :  { %725 = vmatmul.f32.vlgmr.msrb.gmra.mxu0 %v689_v17  ;;  %v837_v1 = vld [vmem:[%s1397_s11] sm:$0x1] }
 0x2dc   :  { %781 = vmatpush.msra.mxu1 %v778_v25  ;;  %802 = vmatpush.msra.mxu2 %v778_v25 }
 0x2de   :  { %782 = vmatpush.msra.mxu1 %v777_v0  ;;  %803 = vmatpush.msra.mxu2 %v777_v0 }
 0x2e0   :  { %783 = vmatpush.msra.mxu1 %v776_v35  ;;  %804 = vmatpush.msra.mxu2 %v776_v35 }
 0x2e2   :  { %784 = vmatpush.msra.mxu1 %v775_v24  ;;  %805 = vmatpush.msra.mxu2 %v775_v24 }
 0x2e3   :  { %728 = vmatmul.f32.gmra.mxu0 %v690_v20 }
 0x2e4   :  { %785 = vmatpush.msra.mxu1 %v774_v2  ;;  %806 = vmatpush.msra.mxu2 %v774_v2 }
 0x2e6   :  { %786 = vmatpush.msra.mxu1 %v773_v18  ;;  %807 = vmatpush.msra.mxu2 %v773_v18 }
 0x2e8   :  { %787 = vmatpush.msra.mxu1 %v772_v26  ;;  %808 = vmatpush.msra.mxu2 %v772_v26 }
 0x2ea   :  { %788 = vmatpush.msra.mxu1 %v771_v23  ;;  %809 = vmatpush.msra.mxu2 %v771_v23 }
 0x2eb   :  { %731 = vmatmul.f32.gmra.mxu0 %v691_v10 }
 0x2ec   :  { %789 = vmatpush.msra.mxu1 %v770_v29  ;;  %810 = vmatpush.msra.mxu2 %v770_v29 }
 0x2ee   :  { %790 = vmatpush.msra.mxu1 %v769_v27  ;;  %811 = vmatpush.msra.mxu2 %v769_v27 }
 0x2f0   :  { %791 = vmatpush.msra.mxu1 %v768_v31  ;;  %812 = vmatpush.msra.mxu2 %v768_v31 }
 0x2f2   :  { %792 = vmatpush.msra.mxu1 %v767_v32  ;;  %813 = vmatpush.msra.mxu2 %v767_v32 }
 0x2f3   :  { %734 = vmatmul.f32.gmra.mxu0 %v692_v11 }
 0x2f4   :  { %793 = vmatpush.msra.mxu1 %v766_v33  ;;  %814 = vmatpush.msra.mxu2 %v766_v33 }
 0x2f6   :  { %794 = vmatpush.msra.mxu1 %v765_v28  ;;  %815 = vmatpush.msra.mxu2 %v765_v28 }
 0x2f8   :  { %795 = vmatpush.msra.mxu1 %v764_v36  ;;  %816 = vmatpush.msra.mxu2 %v764_v36 }
 0x358   :  { %v726_v30 = vpop.f32.mrf.mxu0 }
 0x359   :  { %v738_v39 = vmax.f32 %v726_v30, 0.0 }
 0x35b   :  { %v751_v43 = vmul.f32 %v738_v39, %v738_v39 }
 0x360   :  { %v729_v41 = vpop.f32.mrf.mxu0 }
 0x361   :  { %v739_v38 = vmax.f32 %v729_v41, 0.0 }
 0x363   :  { %v752_v42 = vmul.f32 %v739_v38, %v739_v38  ;;  %v742_v44 = vadd.f32 %v739_v38, %v738_v39 }
 0x365   :  { %v755_v47 = vadd.f32 %v752_v42, %v751_v43 }
 0x368   :  { %v732_v37 = vpop.f32.mrf.mxu0 }
 0x369   :  { %v740_v40 = vmax.f32 %v732_v37, 0.0 }
 0x36b   :  { %v753_v45 = vmul.f32 %v740_v40, %v740_v40  ;;  %v743_v48 = vadd.f32 %v742_v44, %v740_v40 }
 0x36d   :  { %v756_v50 = vadd.f32 %v755_v47, %v753_v45 }
 0x370   :  { %v735_v46 = vpop.f32.mrf.mxu0 }
 0x371   :  { %v741_v49 = vmax.f32 %v735_v46, 0.0 }
 0x373   :  { %v744_v51 = vadd.f32 %v743_v48, %v741_v49  ;;  %v754_v52 = vmul.f32 %v741_v49, %v741_v49 }
 0x375   :  { %v745_v53 = vrot.slane %v744_v51, 4  ;;  %v757_v54 = vadd.f32 %v756_v50, %v754_v52 }
 0x377   :  { %v746_v55 = vadd.f32 %v745_v53, %v744_v51  ;;  %v758_v56 = vrot.slane %v757_v54, 4 }
 0x379   :  { %v747_v57 = vrot.slane %v746_v55, 2  ;;  %v759_v58 = vadd.f32 %v758_v56, %v757_v54 }
 0x37b   :  { %v748_v59 = vadd.f32 %v747_v57, %v746_v55  ;;  %v760_v60 = vrot.slane %v759_v58, 2 }
 0x37d   :  { %v749_v61 = vrot.slane %v748_v59, 1  ;;  %v761_v62 = vadd.f32 %v760_v60, %v759_v58 }
 0x37f   :  { %v750_v63 = vadd.f32 %v749_v61, %v748_v59  ;;  %v762_v3 = vrot.slane %v761_v62, 1 }
 0x381   :  { %796 = vmatmul.f32.vlgmr.msra.gmra.mxu1 %v750_v63  ;;  %v763_v4 = vadd.f32 %v762_v3, %v761_v62 }
 0x383   :  { %817 = vmatmul.f32.vlgmr.msra.gmra.mxu2 %v763_v4 }
 0x3fe   :  { %v797_v5 = vpop.f32.mrf.mxu1 }
 0x3ff   :  { %v800_v12 = vmul.f32 0.001953125, %v797_v5 }
 0x401   :  { %v822_v6 = vmul.f32 %v800_v12, %v800_v12 }
 0x406   :  { %v818_v13 = vpop.f32.mrf.mxu2 }
 0x407   :  { %v821_v7 = vmul.f32 0.001953125, %v818_v13 }
 0x409   :  { %v823_v14 = vsub.f32 %v821_v7, %v822_v6 }
 0x40b   :  { %v825_v15 = vadd.f32 1e-05, %v823_v14 }
 0x40d   :  { %902 = vrsqrt.f32 %v825_v15  ;;  %vm832_vm12 = vweird.f32 %v825_v15 }
 0x413   :  { %v903_v16 = vpop.eup %902 }
 0x414   :  { %v827_v17 = vmul.f32 %v903_v16, %v825_v15  ;;  %vm833_vm11 = vweird.f32 %v903_v16 }
 0x415   :  { %vm834_vm13 = vmor %vm832_vm12, %vm833_vm11 }
 0x416   :  { %v828_v8 = vmul.f32 %v903_v16, %v827_v17 }
 0x418   :  { %v829_v19 = vmul.f32 0.5, %v828_v8 }
 0x41a   :  { %v830_v20 = vsub.f32 1.5, %v829_v19 }
 0x41c   :  { %v831_v9 = vmul.f32 %v903_v16, %v830_v20 }
 0x41e   :  { %v835_v10 = vsel %vm834_vm13, %v903_v16, %v831_v9 }
 0x41f   :  { %v836_v22 = vmul.f32 %v835_v10, %v824_v21 }
 0x421   :  { %v838_v11 = vmul.f32 %v836_v22, %v800_v12  ;;  %v841_v34 = vperm.slane %v836_v22, 0 }
 0x423   :  { %v839_v25 = vsub.f32 %v837_v1, %v838_v11  ;;  %v843_v35 = vmul.f32 %v841_v34, %v738_v39  ;;  %v844_v24 = vmul.f32 %v841_v34, %v739_v38  ;;  %v845_v2 = vmul.f32 %v841_v34, %v740_v40 }
 0x424   :  { %v846_v18 = vmul.f32 %v841_v34, %v741_v49 }
 0x425   :  { %v848_v0 = vperm.slane %v839_v25, 0 }
 0x427   :  { %v850_v26 = vadd.f32 %v848_v0, %v843_v35  ;;  %v851_v23 = vadd.f32 %v848_v0, %v844_v24  ;;  %v852_v29 = vadd.f32 %v848_v0, %v845_v2  ;;  %v853_v30 = vadd.f32 %v848_v0, %v846_v18 }
 0x429   :  { %854 = vst [vmem:[#allocation14] sm:$0xff] %v850_v26 }
 0x42a   :  { %855 = vst [vmem:[#allocation14 + $0x8] sm:$0xff] %v851_v23 }
 0x42b   :  { %856 = vst [vmem:[#allocation14 + $0x10] sm:$0xff] %v852_v29 }
 0x42c   :  { %857 = vst [vmem:[#allocation14 + $0x18] sm:$0xff] %v853_v30 }
 0x42d   :  { %870 = dma.vmem_to_hbm [thread:$0]  %s863_s19, 512, %s865_s0, [#allocation5], %s1083_s29, %s1083_s29, %s1084_s30  }
 0x42e   :  { %1080 = dma.done.wait [#allocation5], 512  }
 0x42f   :  { %1081 = vsyncadd [#allocation5], 4294966784 }
 0x430   :  { %875 = vsyncpa [#allocation4], 1 }
 0x431   :  { %876 = vsyncpa [#allocation7], 1 }
 0x432   :  { %877 = vsyncpa [#allocation10], 1 }
 0x433   :  { %878 = vsyncpa [#allocation13], 1 }
 0x434   :  { %879 = vsyncpa [#allocation5], 1 }

</bundles_post_ra>
